<compile_context>
chip_gen: v5e
topology: v5e:2x2
jax: 0.10.0
libtpu: 0.0.40
codegen_flags: <defaults>
</compile_context>

<pallas_src>
import jax
import jax.numpy as jnp
from jax.experimental import pallas as pl
from jax.experimental.pallas import tpu as pltpu


def _round_up(v: int, m: int) -> int:
    return (v + m - 1) // m * m


def _vmem_capacity_bytes() -> int:
    """Physical per-core VMEM; fall back to the smallest generation (v7x, 64 MiB)."""
    try:
        cap = getattr(pltpu.get_tpu_info(), "vmem_capacity_bytes", None)
        if cap:
            return int(cap)
    except Exception:
        pass
    return 64 * 1024 * 1024


# ---------------------------------------------------------------------------
# Kernels
# ---------------------------------------------------------------------------

def _pes_max_fused_kernel(x_ref, wi_ref, b_ref, wp_ref, o_ref):
    """Whole problem in one block: out = x @ W_ind + (max(x, 0) @ W_pool + b)."""
    x = x_ref[...]
    x_max = jnp.max(x, axis=0, keepdims=True)                               # (1, K)   XLU reduce
    c = jnp.dot(x_max, wp_ref[...], preferred_element_type=jnp.float32)     # (1, out) MXU
    c = c + b_ref[...].astype(jnp.float32)
    acc = jnp.dot(x, wi_ref[...], preferred_element_type=jnp.float32)       # (N, out) MXU
    o_ref[...] = (acc + c).astype(o_ref.dtype)


def _pes_max_tiled_kernel(x_ref, w_ref, c_ref, o_ref):
    """One row tile: o = x_tile @ W_ind + c  (c = max(x,0) @ W_pool + b, precomputed)."""
    acc = jnp.dot(x_ref[...], w_ref[...], preferred_element_type=jnp.float32)
    o_ref[...] = (acc + c_ref[...]).astype(o_ref.dtype)


# ---------------------------------------------------------------------------
# Wrapper
# ---------------------------------------------------------------------------

def pe_symetry_max(x, w_ind, b_ind, w_pool, *, block_rows: int = 1024,
                   allow_fast_path: bool = True):
    """PESymetryMax forward.

    x: (N, in_dim); w_ind / w_pool: (in_dim, out_dim) pre-transposed Linear
    weights; b_ind: (out_dim,).  Returns (N, out_dim).
    """
    n, k = x.shape
    n_out = w_ind.shape[1]
    out_dtype = x.dtype
    x_item = jnp.dtype(x.dtype).itemsize
    w_item = jnp.dtype(w_ind.dtype).itemsize
    out_item = jnp.dtype(out_dtype).itemsize

    # ------------------ fast path: single fused block, zero pads/slices ----
    fused_bytes = (
        _round_up(n, 8) * _round_up(k, 128) * x_item            # x
        + 2 * _round_up(k, 8) * _round_up(n_out, 128) * w_item  # W_ind + W_pool
        + 8 * _round_up(n_out, 128) * w_item                    # bias row
        + _round_up(n, 8) * _round_up(n_out, 128) * out_item    # out
    )
    if allow_fast_path and fused_bytes <= 2 * 1024 * 1024:
        cost = pl.CostEstimate(
            flops=2 * (n + 1) * k * n_out,
            transcendentals=0,
            bytes_accessed=(n * k * x_item + 2 * k * n_out * w_item
                            + n_out * w_item + n * n_out * out_item),
        )
        return pl.pallas_call(
            _pes_max_fused_kernel,
            out_shape=jax.ShapeDtypeStruct((n, n_out), out_dtype),
            cost_estimate=cost,
        )(x, w_ind, b_ind.reshape(1, n_out), w_pool)

    # ------------------ tiled path ------------------------------------------
    # Cheap JAX prologue (O(N*K) max + O(K*out) matmul): global max over the
    # set dim and the fused pooled + bias constant, computed once in f32.
    x_max = jnp.max(x, axis=0, keepdims=True)                               # (1, K)
    c = jnp.dot(x_max, w_pool, preferred_element_type=jnp.float32)
    c = c + b_ind.reshape(1, n_out).astype(jnp.float32)                     # (1, out)

    # Lane-dense output dim only (unmasked vst).  x is NOT K-padded and N is
    # NOT padded to the tile: the ragged last row tile is handled by the cdiv
    # grid (rows are independent; trailing stores are masked by Pallas).
    n_out_p = _round_up(n_out, 128)
    if n_out_p != n_out:
        w_ind = jnp.pad(w_ind, ((0, 0), (0, n_out_p - n_out)))
        c = jnp.pad(c, ((0, 0), (0, n_out_p - n_out)))

    # Row tile: multiple of 8 sublanes, <= block_rows, and small enough that
    # there are >= 2 tiles when N allows it (feeds both v7x TensorCores).
    tm = _round_up(min(block_rows, n), 8)
    if n > 16:
        tm = min(tm, _round_up(pl.cdiv(n, 2), 8))
    tm = max(tm, 8)
    grid_m = pl.cdiv(n, tm)

    # VMEM budget: double-buffered x/out tiles; count W_ind and c twice too
    # (the pipeline may double-buffer constant-index-map inputs).  Cap at 75%
    # of physical per-core VMEM so the same tiling is portable to v7x (64 MiB)
    # while still exploiting v5e/v6e's 128 MiB.
    tile_bytes = (
        2 * tm * _round_up(k, 128) * x_item
        + 2 * tm * n_out_p * out_item
        + 2 * _round_up(k, 8) * n_out_p * w_item
        + 2 * 8 * n_out_p * 4
    )
    vmem_cap = _vmem_capacity_bytes()
    vmem_limit = int(min(vmem_cap * 3 // 4,
                         max(32 * 1024 * 1024, tile_bytes + (4 << 20))))

    cost = pl.CostEstimate(
        flops=2 * n * k * n_out_p,
        transcendentals=0,
        bytes_accessed=(n * k * x_item + k * n_out_p * w_item
                        + n_out_p * 4 + n * n_out_p * out_item),
    )

    out_p = pl.pallas_call(
        _pes_max_tiled_kernel,
        out_shape=jax.ShapeDtypeStruct((n, n_out_p), out_dtype),
        grid=(grid_m,),
        in_specs=[
            pl.BlockSpec((tm, k), lambda i: (i, 0)),          # x row tiles (pipelined, full K)
            pl.BlockSpec((k, n_out_p), lambda i: (0, 0)),     # W_ind: VMEM-resident
            pl.BlockSpec((1, n_out_p), lambda i: (0, 0)),     # fused pooled+bias: resident
        ],
        out_specs=pl.BlockSpec((tm, n_out_p), lambda i: (i, 0)),
        compiler_params=pltpu.CompilerParams(
            # Row tiles are independent -> v7x shards them across both
            # TensorCores; harmless no-op on single-TC v5e/v6e.
            dimension_semantics=("parallel",),
            vmem_limit_bytes=vmem_limit,
        ),
        cost_estimate=cost,
    )(x, w_ind, c)

    if n_out_p != n_out:
        # Column slice only (no row slice: output rows were never padded).
        # Consumers that accept a lane-padded (n, n_out_p) output can skip it.
        out_p = out_p[:, :n_out]
    return out_p


def pe_symetry_max_ref(x, w_ind, b_ind, w_pool):
    x_max = jnp.max(x, axis=0, keepdims=True)
    return x @ w_ind + b_ind + x_max @ w_pool


if __name__ == "__main__":
    def make_case(key, n, in_dim, out_dim):
        k_x, k_wi, k_bi, k_wp = jax.random.split(key, 4)
        bound = 1.0 / jnp.sqrt(jnp.float32(in_dim))
        x = jax.random.normal(k_x, (n, in_dim), dtype=jnp.float32)
        w_ind = jax.random.uniform(k_wi, (in_dim, out_dim), jnp.float32, -bound, bound)
        b_ind = jax.random.uniform(k_bi, (out_dim,), jnp.float32, -bound, bound)
        w_pool = jax.random.uniform(k_wp, (in_dim, out_dim), jnp.float32, -bound, bound)
        return x, w_ind, b_ind, w_pool

    keys = jax.random.split(jax.random.PRNGKey(0), 3)

    # Case 1: module-scale shape (10 agents, 48 -> 96) -> fully fused
    # single-block fast path (no pads, no prologue HLOs, no epilogue slice).
    x, w_ind, b_ind, w_pool = make_case(keys[0], 10, 48, 96)
    out = jax.block_until_ready(pe_symetry_max(x, w_ind, b_ind, w_pool))
    ref = pe_symetry_max_ref(x, w_ind, b_ind, w_pool)
    assert out.shape == ref.shape
    assert jnp.allclose(out, ref, atol=1e-4, rtol=1e-4), "case 1 mismatch vs reference"

    # Case 2: tiled path, unaligned K/out and a ragged last row tile
    # (300 x 48 -> 96, tile 128 -> grid 3): no K/N padding, out padded to 128.
    x, w_ind, b_ind, w_pool = make_case(keys[1], 300, 48, 96)
    out = jax.block_until_ready(
        pe_symetry_max(x, w_ind, b_ind, w_pool, block_rows=128, allow_fast_path=False))
    ref = pe_symetry_max_ref(x, w_ind, b_ind, w_pool)
    assert out.shape == ref.shape
    assert jnp.allclose(out, ref, atol=1e-4, rtol=1e-4), "case 2 mismatch vs reference"

    # Case 3: tiled path, already lane-dense (256 x 128 -> 128, 2 row tiles):
    # no padding or slicing anywhere; exercises the >=2-tile "parallel" grid.
    x, w_ind, b_ind, w_pool = make_case(keys[2], 256, 128, 128)
    out = jax.block_until_ready(
        pe_symetry_max(x, w_ind, b_ind, w_pool, block_rows=128, allow_fast_path=False))
    ref = pe_symetry_max_ref(x, w_ind, b_ind, w_pool)
    assert out.shape == ref.shape
    assert jnp.allclose(out, ref, atol=1e-4, rtol=1e-4), "case 3 mismatch vs reference"

    print("KERNEL_OK")
</pallas_src>

<mosaic_0001>
module attributes {stable_mosaic.version = 11 : i64} {
  func.func @_pes_max_fused_kernel(%arg0: memref<10x48xf32, #tpu.memory_space<vmem>>, %arg1: memref<48x96xf32, #tpu.memory_space<vmem>>, %arg2: memref<1x96xf32, #tpu.memory_space<vmem>>, %arg3: memref<48x96xf32, #tpu.memory_space<vmem>>, %arg4: memref<10x96xf32, #tpu.memory_space<vmem>>) attributes {dimension_semantics = [], scalar_prefetch = 0 : i64, scratch_operands = 0 : i64, tpu.core_type = #tpu.core_type<tc>} {
    %c0 = arith.constant 0 : index
    %c0_0 = arith.constant 0 : index
    %0 = vector.load %arg0[%c0, %c0_0] : memref<10x48xf32, #tpu.memory_space<vmem>>, vector<10x48xf32>
    %cst = arith.constant dense<0xFF800000> : vector<48xf32>
    %1 = vector.multi_reduction <maximumf>, %0, %cst [0] : vector<10x48xf32> to vector<48xf32>
    %2 = vector.shape_cast %1 : vector<48xf32> to vector<1x48xf32>
    %c0_1 = arith.constant 0 : index
    %c0_2 = arith.constant 0 : index
    %3 = vector.load %arg3[%c0_1, %c0_2] : memref<48x96xf32, #tpu.memory_space<vmem>>, vector<48x96xf32>
    %cst_3 = arith.constant dense<0.000000e+00> : vector<1x96xf32>
    %4 = tpu.matmul %2, %3, %cst_3 {dimension_numbers = #tpu.dot_dimension_numbers<[1], [0], [0], [1], [0, 0, 1, 1], [], []>} : vector<1x48xf32>, vector<48x96xf32>, vector<1x96xf32> -> vector<1x96xf32>
    %c0_4 = arith.constant 0 : index
    %c0_5 = arith.constant 0 : index
    %5 = vector.load %arg2[%c0_4, %c0_5] : memref<1x96xf32, #tpu.memory_space<vmem>>, vector<1x96xf32>
    %6 = arith.addf %4, %5 : vector<1x96xf32>
    %c0_6 = arith.constant 0 : index
    %c0_7 = arith.constant 0 : index
    %7 = vector.load %arg1[%c0_6, %c0_7] : memref<48x96xf32, #tpu.memory_space<vmem>>, vector<48x96xf32>
    %cst_8 = arith.constant dense<0.000000e+00> : vector<10x96xf32>
    %8 = tpu.matmul %0, %7, %cst_8 {dimension_numbers = #tpu.dot_dimension_numbers<[1], [0], [0], [1], [0, 0, 1, 1], [], []>} : vector<10x48xf32>, vector<48x96xf32>, vector<10x96xf32> -> vector<10x96xf32>
    %9 = vector.broadcast %6 : vector<1x96xf32> to vector<10x96xf32>
    %10 = arith.addf %8, %9 : vector<10x96xf32>
    %c0_9 = arith.constant 0 : index
    %c0_10 = arith.constant 0 : index
    %11 = vector.load %arg4[%c0_9, %c0_10] : memref<10x96xf32, #tpu.memory_space<vmem>>, vector<10x96xf32>
    tpu.vector_store %arg4[%c0_9, %c0_10], %10 {strides = array<i32>} : memref<10x96xf32, #tpu.memory_space<vmem>>, vector<10x96xf32>,
    return
  }
}

</mosaic_0001>

<bundles_post_ra>
// kernel: tpu_custom_call.1
= control target key start
LH: loop header
LB: loop body
LE: loop exit
PB: predicated region body
PF: predicated region fallthrough
CT: control target
= control target key end

     0   :  { %9 = vsyncpa [#allocation3], 0  ;;  %s347_s0 = inlined_call_operand.hbm [shape: f32[10,48], index: 0, kind: input, shape index: {}]   ;;  %s348_s1 = inlined_call_operand.hbm [shape: f32[48,96], index: 1, kind: input, shape index: {}]   ;;  %s349_s2 = inlined_call_operand.vmem [shape: f32[1,96], index: 2, kind: input, shape index: {}]   ;;  %s350_s3 = inlined_call_operand.hbm [shape: f32[48,96], index: 3, kind: input, shape index: {}]   ;;  %s351_s4 = inlined_call_operand.hbm [shape: f32[10,96], index: 4, kind: output, shape index: {}]  }
   0x1   :  { %10 = vsyncpa [#allocation6], 0 }
   0x2   :  { %11 = vsyncpa [#allocation4], 0  ;;  %s29_s17 = sshll.u32 %s348_s1, 4  ;;  %s285_s18 = smov [#allocation5]   ;;  %s30_s17 = int_to_ptr.hbm [resolvable:$true] %s29_s17 }
   0x3   :  { %s31_s19 = sshll.u32 %s285_s18, 4  ;;  %s16_s22 = sshll.u32 %s347_s0, 4  ;;  %s32_s19 = int_to_ptr.vmem [resolvable:$true] %s31_s19  ;;  %s17_s22 = int_to_ptr.hbm [resolvable:$true] %s16_s22 }
   0x4   :  { %s286_s23 = smov 128   ;;  %s287_s24 = smov 8  }
   0x5   :  { %37 = dma.hbm_to_vmem [thread:$0]  %s30_s17, 768, %s32_s19, [#allocation6], %s286_s23, %s286_s23, %s287_s24  }
   0x6   :  { %s288_s25 = smov [#allocation2]   ;;  %s44_s1 = sshll.u32 %s350_s3, 4  ;;  %s45_s1 = int_to_ptr.hbm [resolvable:$true] %s44_s1 }
   0x7   :  { %s18_s26 = sshll.u32 %s288_s25, 4  ;;  %s289_s0 = smov [#allocation7]   ;;  %s19_s26 = int_to_ptr.vmem [resolvable:$true] %s18_s26 }
   0x8   :  { %24 = dma.hbm_to_vmem [thread:$0]  %s17_s22, 256, %s19_s26, [#allocation3], %s286_s23, %s286_s23, %s287_s24  }
   0x9   :  { %s46_s29 = sshll.u32 %s289_s0, 4  ;;  %s47_s29 = int_to_ptr.vmem [resolvable:$true] %s46_s29 }
   0xa   :  { %52 = dma.hbm_to_vmem [thread:$0]  %s45_s1, 768, %s47_s29, [#allocation6], %s286_s23, %s286_s23, %s287_s24  }
   0xb   :  { %279 = dma.done.wait [#allocation3], 256  }
   0xc   :  { %280 = vsyncadd [#allocation3], 4294967040 }
   0xd   :  { %281 = dma.done.wait [#allocation6], 1536  }
   0xe   :  { %282 = vsyncadd [#allocation6], 4294965760  ;;  %v113_v0 = vld [vmem:[#allocation5 + $0x28] sm:$0xff]  ;;  %v83_v1 = vld [vmem:[#allocation7 + $0x28] sm:$0xff]  ;;  %vm67_vm0 = vcmask 392192   ;;  %vm69_vm1 = vcmask 386048  }
   0xf   :  { %v112_v2 = vld [vmem:[#allocation5 + $0x20] sm:$0xff]  ;;  %171 = vmatpush.msra.mxu2 %v113_v0  ;;  %98 = vmatpush.msra.mxu0 %v83_v1  ;;  %v82_v3 = vld [vmem:[#allocation7 + $0x20] sm:$0xff]  ;;  %v111_v4 = vld [vmem:[#allocation5 + $0x18] sm:$0xff]  ;;  %s290_s5 = smov [#allocation8]   ;;  %s154_s9 = sshll.u32 %s351_s4, 4  ;;  %vm144_vm2 = vcmask 785408   ;;  %s155_s9 = int_to_ptr.hbm [resolvable:$true] %s154_s9 }
  0x10   :  { %v81_v5 = vld [vmem:[#allocation7 + $0x18] sm:$0xff]  ;;  %131 = vmatpush.msra.mxu1 %v113_v0  ;;  %v65_v6 = vld [vmem:[#allocation2] sm:$0xff]  ;;  %v80_v8 = vld [vmem:[#allocation7 + $0x10] sm:$0xff]  ;;  %s152_s6 = sshll.u32 %s290_s5, 4  ;;  %vm146_vm3 = vcmask 779264   ;;  %s153_s6 = int_to_ptr.vmem [resolvable:$true] %s152_s6 }
  0x11   :  { %172 = vmatpush.msra.mxu2 %v112_v2  ;;  %99 = vmatpush.msra.mxu0 %v82_v3  ;;  %v110_v7 = vld [vmem:[#allocation5 + $0x10] sm:$0xff]  ;;  %v66_v9 = vld [vmem:[#allocation2 + $0x8] sm:$0x3]  ;;  %v68_v10 = vsel %vm67_vm0, %v65_v6, -inf  ;;  %v109_v12 = vld [vmem:[#allocation5 + $0x8] sm:$0xff] }
  0x12   :  { %132 = vmatpush.msra.mxu1 %v112_v2  ;;  %v70_v11 = vsel %vm69_vm1, %v66_v9, -inf  ;;  %v79_v13 = vld [vmem:[#allocation7 + $0x8] sm:$0xff]  ;;  %v108_v15 = vld [vmem:[#allocation5] sm:$0xff]  ;;  %v78_v17 = vld [vmem:[#allocation7] sm:$0xff] }
  0x13   :  { %173 = vmatpush.msra.mxu2 %v111_v4  ;;  %100 = vmatpush.msra.mxu0 %v81_v5  ;;  %v71_v14 = vmax.f32 %v68_v10, %v70_v11  ;;  %v84_v23 = vld [vmem:[%s349_s2] sm:$0x1] }
  0x14   :  { %133 = vmatpush.msra.mxu1 %v111_v4 }
  0x15   :  { %174 = vmatpush.msra.mxu2 %v110_v7  ;;  %101 = vmatpush.msra.mxu0 %v80_v8  ;;  %v72_v16 = vrot.slane %v71_v14, 4 }
  0x16   :  { %134 = vmatpush.msra.mxu1 %v110_v7 }
  0x17   :  { %175 = vmatpush.msra.mxu2 %v109_v12  ;;  %102 = vmatpush.msra.mxu0 %v79_v13  ;;  %v73_v18 = vmax.f32 %v71_v14, %v72_v16 }
  0x18   :  { %135 = vmatpush.msra.mxu1 %v109_v12 }
  0x19   :  { %176 = vmatpush.msra.mxu2 %v108_v15  ;;  %103 = vmatpush.msra.mxu0 %v78_v17  ;;  %v74_v19 = vrot.slane %v73_v18, 2 }
  0x1a   :  { %170 = vmatmul.msk.f32.vlgmr.msra.gmra.mxu2 %vm67_vm0, %v66_v9  ;;  %136 = vmatpush.msra.mxu1 %v108_v15 }
  0x1b   :  { %169 = vmatmul.msk.f32.vlgmr.msra.gmra.mxu1 %vm67_vm0, %v65_v6  ;;  %v75_v20 = vmax.f32 %v73_v18, %v74_v19 }
  0x1d   :  { %v76_v21 = vrot.slane %v75_v20, 1 }
  0x1f   :  { %v77_v22 = vmax.f32 %v75_v20, %v76_v21 }
  0x21   :  { %168 = vmatmul.msk.f32.vlgmr.msra.gmra.mxu0 %vm67_vm0, %v77_v22 }
  0x98   :  { %v138_v26 = vpop.f32.mrf.mxu1 }
  0x9d   :  { %v141_v27 = vpop.f32.mrf.mxu2 }
  0x9e   :  { %v105_v24 = vpop.f32.mrf.mxu0 }
  0x9f   :  { %v106_v25 = vadd.f32 %v105_v24, %v84_v23 }
  0xa1   :  { %v114_v28 = vperm.slane %v106_v25, 0 }
  0xa3   :  { %v139_v29 = vadd.f32 %v138_v26, %v114_v28  ;;  %v142_v30 = vadd.f32 %v141_v27, %v114_v28 }
  0xa5   :  { %145 = vst.msk [vmem:[#allocation8] sm:$0xff] %vm144_vm2, %v139_v29 }
  0xa6   :  { %147 = vst.msk [vmem:[#allocation8 + $0x8] sm:$0x3] %vm146_vm3, %v142_v30 }
  0xa7   :  { %160 = dma.vmem_to_hbm [thread:$0]  %s153_s6, 256, %s155_s9, [#allocation4], %s286_s23, %s286_s23, %s287_s24  }
  0xa8   :  { %283 = dma.done.wait [#allocation4], 256  }
  0xa9   :  { %284 = vsyncadd [#allocation4], 4294967040 }
  0xaa   :  { %165 = vsyncpa [#allocation3], 1 }
  0xab   :  { %166 = vsyncpa [#allocation6], 1 }
  0xac   :  { %167 = vsyncpa [#allocation4], 1 }

</bundles_post_ra>
